<compile_context>
chip_gen: v7x
topology: tpu7x:2x2x1
jax: 0.10.0
libtpu: 0.0.40
codegen_flags: <defaults>
</compile_context>

<pallas_src>
import math

import numpy as np
import jax
import jax.numpy as jnp
from jax.experimental import pallas as pl
from jax.experimental.pallas import tpu as pltpu  # noqa: F401  (TPU backend)

BN_EPS = 1e-5
REPARAM_EPS = 1e-10
SOFTPLUS_THRESHOLD = 20.0


def _round_up(n, m):
    return ((n + m - 1) // m) * m


# ----------------------------------------------------------------------------
# In-kernel math helpers (operate on values, not refs)
# ----------------------------------------------------------------------------
def _apply_act(y, act):
    if act == "Linear":
        return y
    if act == "ReLU":
        return jnp.maximum(y, 0.0)
    if act == "Tanh":
        return jnp.tanh(y)
    if act == "Sigmoid":
        e = jnp.exp(-jnp.abs(y))
        return jnp.where(y >= 0.0, 1.0 / (1.0 + e), e / (1.0 + e))
    # TODO(synk): other torch.nn activations not mapped; extend as needed.
    raise ValueError(f"unsupported activation: {act}")


def _softplus(v):
    # PyTorch F.softplus(beta=1, threshold=20): identity above threshold.
    sp = jnp.log1p(jnp.exp(jnp.minimum(v, SOFTPLUS_THRESHOLD)))
    return jnp.where(v > SOFTPLUS_THRESHOLD, v, sp)


# ----------------------------------------------------------------------------
# Single fused forward kernel (3 inputs, 1 output)
# ----------------------------------------------------------------------------
def build_fused_vae_kernel(enc_blocks, head, dec_blocks, latent_dim):
    """enc_blocks / dec_blocks: tuples of (w_row, in, out, gamma_row, beta_row, act).
    head: (w_row, in, 2*latent_dim, bias_row).  All offsets are static Python ints."""
    head_row, head_in, head_out, head_bias_row = head

    def kernel(x_ref, eps_ref, p_ref, out_ref):
        def linear_bn_act(h, spec):
            wr, din, dout, gr, br, act = spec
            # Linear (bias omitted: cancelled by the batch-mean subtraction below).
            y = jnp.dot(h, p_ref[wr:wr + din, :dout],
                        preferred_element_type=jnp.float32)
            # BatchNorm1d (training mode): single-pass biased batch statistics.
            mu = jnp.mean(y, axis=0, keepdims=True)
            msq = jnp.mean(y * y, axis=0, keepdims=True)
            var = jnp.maximum(msq - mu * mu, 0.0)
            scale = p_ref[gr:gr + 1, :dout] * jax.lax.rsqrt(var + BN_EPS)
            return _apply_act((y - mu) * scale + p_ref[br:br + 1, :dout], act)

        # ---------------- encoder trunk ----------------
        h = x_ref[...]
        for spec in enc_blocks:
            h = linear_bn_act(h, spec)

        # -------- fused heads: one matmul for [z_mu | pre-softplus var] --------
        heads = (jnp.dot(h, p_ref[head_row:head_row + head_in, :head_out],
                         preferred_element_type=jnp.float32)
                 + p_ref[head_bias_row:head_bias_row + 1, :head_out])

        lane = jax.lax.broadcasted_iota(jnp.int32, heads.shape, 1)
        is_mu = lane < latent_dim
        sp = _softplus(heads)                      # == z_var on the var lanes
        muvar = jnp.where(is_mu, heads, sp)        # packed [ z_mu | z_var ]

        # -------- reparametrization, kept lane-aligned (no sub-128-lane slices) ----
        # eps_ref lanes [0,L) are zero, lanes [L,2L) hold the N(0,1) noise, so
        #   z_split = [ z_mu | std*eps ]
        # and the first decoder weight has its L rows duplicated at pack time, so
        #   z_split @ W0_dup == (z_mu + std*eps) @ W0 == z @ W0.
        std = jnp.sqrt(sp + REPARAM_EPS)
        z_split = jnp.where(is_mu, heads, 0.0) + std * eps_ref[...]

        # ---------------- decoder ----------------
        h = z_split
        for spec in dec_blocks:
            h = linear_bn_act(h, spec)

        # ---------------- single packed output slab ----------------
        out_ref[:, : 2 * latent_dim] = muvar
        out_ref[:, 2 * latent_dim:] = h

    return kernel


# ----------------------------------------------------------------------------
# Parameter init (mirrors the PyTorch __init__: xavier_uniform weights, zero bias,
# BatchNorm1d gamma=1 / beta=0).  Trunk Linear biases are not materialized: they are
# exactly cancelled by the train-mode BatchNorm that follows every trunk Linear.
# ----------------------------------------------------------------------------
def xavier_uniform(key, fan_in, fan_out):
    bound = math.sqrt(6.0 / (fan_in + fan_out))
    # stored as (in, out) so the kernel computes x @ W directly
    return jax.random.uniform(key, (fan_in, fan_out), dtype=jnp.float32,
                              minval=-bound, maxval=bound)


def init_vae_params(key, encoder_neurons, decoder_neurons, latent_dim):
    n_enc = len(encoder_neurons) - 1
    n_dec = len(decoder_neurons)
    keys = jax.random.split(key, n_enc + n_dec + 2)
    ki = iter(keys)
    raw = {"enc": [], "dec": []}
    for i in range(n_enc):
        din, dout = encoder_neurons[i], encoder_neurons[i + 1]
        raw["enc"].append(dict(
            w=xavier_uniform(next(ki), din, dout),
            gamma=jnp.ones((dout,), jnp.float32),
            beta=jnp.zeros((dout,), jnp.float32)))
    enc_last = encoder_neurons[-1]
    raw["w_mean"] = xavier_uniform(next(ki), enc_last, latent_dim)
    raw["w_var"] = xavier_uniform(next(ki), enc_last, latent_dim)
    raw["b_mean"] = jnp.zeros((latent_dim,), jnp.float32)
    raw["b_var"] = jnp.zeros((latent_dim,), jnp.float32)
    dec_in = [latent_dim] + list(decoder_neurons[:-1])
    for i in range(n_dec):
        din, dout = dec_in[i], decoder_neurons[i]
        raw["dec"].append(dict(
            w=xavier_uniform(next(ki), din, dout),
            gamma=jnp.ones((dout,), jnp.float32),
            beta=jnp.zeros((dout,), jnp.float32)))
    return raw


# ----------------------------------------------------------------------------
# Pack every parameter into a single (rows, width) f32 slab + static plan.
# ----------------------------------------------------------------------------
def pack_vae_params(raw, encoder_activation, decoder_activation, latent_dim):
    pieces, row = [], 0

    def add_matrix(m):
        nonlocal row
        r0 = _round_up(row, 8)               # keep matrix row offsets 8-aligned
        pieces.append((r0, np.asarray(m, np.float32)))
        row = r0 + m.shape[0]
        return r0

    def add_vector(v):
        nonlocal row
        r0 = row
        pieces.append((r0, np.asarray(v, np.float32).reshape(1, -1)))
        row = r0 + 1
        return r0

    enc_blocks = []
    for blk, act in zip(raw["enc"], encoder_activation):
        din, dout = blk["w"].shape
        enc_blocks.append((add_matrix(blk["w"]), din, dout,
                           add_vector(blk["gamma"]), add_vector(blk["beta"]), act))

    # fused heads: columns [:, :L] = mean_layer, [:, L:] = var_layer (pre-softplus)
    wh = jnp.concatenate([raw["w_mean"], raw["w_var"]], axis=1)
    bh = jnp.concatenate([raw["b_mean"], raw["b_var"]], axis=0)
    head = (add_matrix(wh), wh.shape[0], wh.shape[1], add_vector(bh))

    dec_blocks = []
    for i, (blk, act) in enumerate(zip(raw["dec"], decoder_activation)):
        w = blk["w"]
        if i == 0:
            # Duplicate the L rows so the (B, 2L) reparam slab [z_mu | std*eps]
            # contracts to exactly (z_mu + std*eps) @ W0 (see kernel).
            w = jnp.concatenate([w, w], axis=0)
        din, dout = w.shape
        dec_blocks.append((add_matrix(w), din, dout,
                           add_vector(blk["gamma"]), add_vector(blk["beta"]), act))

    width = max(arr.shape[1] for _, arr in pieces)
    slab = np.zeros((_round_up(row, 8), width), np.float32)
    for r0, arr in pieces:
        slab[r0:r0 + arr.shape[0], :arr.shape[1]] = arr
    return jnp.asarray(slab), tuple(enc_blocks), head, tuple(dec_blocks)


# ----------------------------------------------------------------------------
# Wrapper: one pallas_call for the whole network
# ----------------------------------------------------------------------------
def vae_forward(slab, enc_blocks, head, dec_blocks, latent_dim, x, eps):
    B = x.shape[0]
    dec_out = dec_blocks[-1][2]
    xf = x.reshape(B, -1).astype(jnp.float32)           # x.view(x.size(0), -1)
    # Place the N(0,1) noise in the HIGH half of a (B, 2L) slab (zeros in the low half)
    # so the kernel's lane-aligned reparametrization needs no lane shuffle.
    eps_hi = jnp.concatenate(
        [jnp.zeros((B, latent_dim), jnp.float32), eps.astype(jnp.float32)], axis=-1)
    # TODO(synk): eps could be generated in-kernel with pltpu.prng_seed/prng_random_bits
    # to drop one input DMA, at the cost of RNG-stream parity with the caller.

    kernel = build_fused_vae_kernel(enc_blocks, head, dec_blocks, latent_dim)
    out = pl.pallas_call(
        kernel,
        out_shape=jax.ShapeDtypeStruct((B, 2 * latent_dim + dec_out), jnp.float32),
    )(xf, eps_hi, slab)

    return {
        "z_mu": out[:, :latent_dim],
        "z_var": out[:, latent_dim:2 * latent_dim],
        "x_rec": out[:, 2 * latent_dim:],
    }


# ----------------------------------------------------------------------------
# Pure-JAX reference (mirrors the PyTorch module in train mode) for validation
# ----------------------------------------------------------------------------
def vae_reference(raw, x, eps, encoder_activation, decoder_activation):
    def bn_block(h, blk, act):
        y = h @ blk["w"]
        mu = jnp.mean(y, axis=0, keepdims=True)
        var = jnp.mean((y - mu) ** 2, axis=0, keepdims=True)
        y = (y - mu) * jax.lax.rsqrt(var + BN_EPS) * blk["gamma"] + blk["beta"]
        return _apply_act(y, act)

    h = x.reshape(x.shape[0], -1).astype(jnp.float32)
    for blk, act in zip(raw["enc"], encoder_activation):
        h = bn_block(h, blk, act)
    z_mu = h @ raw["w_mean"] + raw["b_mean"]
    z_var = _softplus(h @ raw["w_var"] + raw["b_var"])
    z = z_mu + jnp.sqrt(z_var + REPARAM_EPS) * eps
    g = z
    for blk, act in zip(raw["dec"], decoder_activation):
        g = bn_block(g, blk, act)
    return {"z_mu": z_mu, "z_var": z_var, "x_rec": g}


# ----------------------------------------------------------------------------
# Main
# ----------------------------------------------------------------------------
if __name__ == "__main__":
    encoder_neurons = [64, 32, 16]
    encoder_activation = ["ReLU", "ReLU"]
    decoder_neurons = [16, 32, 64]
    decoder_activation = ["ReLU", "ReLU", "Linear"]
    latent_dim = 8
    batch = 8

    root = jax.random.PRNGKey(0)
    k_param, k_x, k_eps = jax.random.split(root, 3)

    raw = init_vae_params(k_param, encoder_neurons, decoder_neurons, latent_dim)
    slab, enc_blocks, head, dec_blocks = pack_vae_params(
        raw, encoder_activation, decoder_activation, latent_dim)

    # Input resembling a small image batch: (B, C, H, W) = (8, 4, 4, 4) -> flattened to 64.
    x = jax.random.normal(k_x, (batch, 4, 4, 4), dtype=jnp.float32)
    eps = jax.random.normal(k_eps, (batch, latent_dim), dtype=jnp.float32)

    out = vae_forward(slab, enc_blocks, head, dec_blocks, latent_dim, x, eps)
    jax.block_until_ready(out)

    ref = vae_reference(raw, x, eps, encoder_activation, decoder_activation)
    assert out["z_mu"].shape == (batch, latent_dim)
    assert out["z_var"].shape == (batch, latent_dim)
    assert out["x_rec"].shape == (batch, decoder_neurons[-1])
    assert bool(jnp.all(out["z_var"] >= 0.0))
    for k in ("z_mu", "z_var", "x_rec"):
        assert bool(jnp.all(jnp.isfinite(out[k]))), k
        assert bool(jnp.allclose(out[k], ref[k], rtol=2e-3, atol=2e-3)), k

    print("KERNEL_OK")
</pallas_src>

<mosaic_0001>
module attributes {stable_mosaic.version = 11 : i64} {
  func.func @kernel(%arg0: memref<8x64xf32, #tpu.memory_space<vmem>>, %arg1: memref<8x16xf32, #tpu.memory_space<vmem>>, %arg2: memref<224x64xf32, #tpu.memory_space<vmem>>, %arg3: memref<8x80xf32, #tpu.memory_space<vmem>>) attributes {dimension_semantics = [], scalar_prefetch = 0 : i64, scratch_operands = 0 : i64, tpu.core_type = #tpu.core_type<tc>} {
    %c0 = arith.constant 0 : index
    %c0_0 = arith.constant 0 : index
    %0 = vector.load %arg0[%c0, %c0_0] : memref<8x64xf32, #tpu.memory_space<vmem>>, vector<8x64xf32>
    %c0_1 = arith.constant 0 : index
    %c0_2 = arith.constant 0 : index
    %1 = vector.load %arg2[%c0_1, %c0_2] : memref<224x64xf32, #tpu.memory_space<vmem>>, vector<64x32xf32>
    %cst = arith.constant dense<0.000000e+00> : vector<8x32xf32>
    %2 = tpu.matmul %0, %1, %cst {dimension_numbers = #tpu.dot_dimension_numbers<[1], [0], [0], [1], [0, 0, 1, 1], [], []>} : vector<8x64xf32>, vector<64x32xf32>, vector<8x32xf32> -> vector<8x32xf32>
    %cst_3 = arith.constant dense<0.000000e+00> : vector<32xf32>
    %3 = vector.multi_reduction <add>, %2, %cst_3 [0] : vector<8x32xf32> to vector<32xf32>
    %4 = vector.shape_cast %3 : vector<32xf32> to vector<1x32xf32>
    %cst_4 = arith.constant 8.000000e+00 : f32
    %5 = vector.broadcast %cst_4 : f32 to vector<1x32xf32>
    %6 = arith.divf %4, %5 : vector<1x32xf32>
    %7 = arith.mulf %2, %2 : vector<8x32xf32>
    %cst_5 = arith.constant dense<0.000000e+00> : vector<32xf32>
    %8 = vector.multi_reduction <add>, %7, %cst_5 [0] : vector<8x32xf32> to vector<32xf32>
    %9 = vector.shape_cast %8 : vector<32xf32> to vector<1x32xf32>
    %cst_6 = arith.constant 8.000000e+00 : f32
    %10 = vector.broadcast %cst_6 : f32 to vector<1x32xf32>
    %11 = arith.divf %9, %10 : vector<1x32xf32>
    %12 = arith.mulf %6, %6 : vector<1x32xf32>
    %13 = arith.subf %11, %12 : vector<1x32xf32>
    %cst_7 = arith.constant 0.000000e+00 : f32
    %14 = vector.broadcast %cst_7 : f32 to vector<1x32xf32>
    %15 = arith.maximumf %13, %14 : vector<1x32xf32>
    %c64 = arith.constant 64 : index
    %c0_8 = arith.constant 0 : index
    %16 = vector.load %arg2[%c64, %c0_8] : memref<224x64xf32, #tpu.memory_space<vmem>>, vector<1x32xf32>
    %cst_9 = arith.constant 9.99999974E-6 : f32
    %17 = vector.broadcast %cst_9 : f32 to vector<1x32xf32>
    %18 = arith.addf %15, %17 : vector<1x32xf32>
    %19 = math.rsqrt %18 : vector<1x32xf32>
    %20 = arith.mulf %16, %19 : vector<1x32xf32>
    %21 = vector.broadcast %6 : vector<1x32xf32> to vector<8x32xf32>
    %22 = arith.subf %2, %21 : vector<8x32xf32>
    %23 = vector.broadcast %20 : vector<1x32xf32> to vector<8x32xf32>
    %24 = arith.mulf %22, %23 : vector<8x32xf32>
    %c65 = arith.constant 65 : index
    %c0_10 = arith.constant 0 : index
    %25 = vector.load %arg2[%c65, %c0_10] : memref<224x64xf32, #tpu.memory_space<vmem>>, vector<1x32xf32>
    %26 = vector.broadcast %25 : vector<1x32xf32> to vector<8x32xf32>
    %27 = arith.addf %24, %26 : vector<8x32xf32>
    %cst_11 = arith.constant 0.000000e+00 : f32
    %28 = vector.broadcast %cst_11 : f32 to vector<8x32xf32>
    %29 = arith.maximumf %27, %28 : vector<8x32xf32>
    %c72 = arith.constant 72 : index
    %c0_12 = arith.constant 0 : index
    %30 = vector.load %arg2[%c72, %c0_12] : memref<224x64xf32, #tpu.memory_space<vmem>>, vector<32x16xf32>
    %cst_13 = arith.constant dense<0.000000e+00> : vector<8x16xf32>
    %31 = tpu.matmul %29, %30, %cst_13 {dimension_numbers = #tpu.dot_dimension_numbers<[1], [0], [0], [1], [0, 0, 1, 1], [], []>} : vector<8x32xf32>, vector<32x16xf32>, vector<8x16xf32> -> vector<8x16xf32>
    %cst_14 = arith.constant dense<0.000000e+00> : vector<16xf32>
    %32 = vector.multi_reduction <add>, %31, %cst_14 [0] : vector<8x16xf32> to vector<16xf32>
    %33 = vector.shape_cast %32 : vector<16xf32> to vector<1x16xf32>
    %cst_15 = arith.constant 8.000000e+00 : f32
    %34 = vector.broadcast %cst_15 : f32 to vector<1x16xf32>
    %35 = arith.divf %33, %34 : vector<1x16xf32>
    %36 = arith.mulf %31, %31 : vector<8x16xf32>
    %cst_16 = arith.constant dense<0.000000e+00> : vector<16xf32>
    %37 = vector.multi_reduction <add>, %36, %cst_16 [0] : vector<8x16xf32> to vector<16xf32>
    %38 = vector.shape_cast %37 : vector<16xf32> to vector<1x16xf32>
    %cst_17 = arith.constant 8.000000e+00 : f32
    %39 = vector.broadcast %cst_17 : f32 to vector<1x16xf32>
    %40 = arith.divf %38, %39 : vector<1x16xf32>
    %41 = arith.mulf %35, %35 : vector<1x16xf32>
    %42 = arith.subf %40, %41 : vector<1x16xf32>
    %cst_18 = arith.constant 0.000000e+00 : f32
    %43 = vector.broadcast %cst_18 : f32 to vector<1x16xf32>
    %44 = arith.maximumf %42, %43 : vector<1x16xf32>
    %c104 = arith.constant 104 : index
    %c0_19 = arith.constant 0 : index
    %45 = vector.load %arg2[%c104, %c0_19] : memref<224x64xf32, #tpu.memory_space<vmem>>, vector<1x16xf32>
    %cst_20 = arith.constant 9.99999974E-6 : f32
    %46 = vector.broadcast %cst_20 : f32 to vector<1x16xf32>
    %47 = arith.addf %44, %46 : vector<1x16xf32>
    %48 = math.rsqrt %47 : vector<1x16xf32>
    %49 = arith.mulf %45, %48 : vector<1x16xf32>
    %50 = vector.broadcast %35 : vector<1x16xf32> to vector<8x16xf32>
    %51 = arith.subf %31, %50 : vector<8x16xf32>
    %52 = vector.broadcast %49 : vector<1x16xf32> to vector<8x16xf32>
    %53 = arith.mulf %51, %52 : vector<8x16xf32>
    %c105 = arith.constant 105 : index
    %c0_21 = arith.constant 0 : index
    %54 = vector.load %arg2[%c105, %c0_21] : memref<224x64xf32, #tpu.memory_space<vmem>>, vector<1x16xf32>
    %55 = vector.broadcast %54 : vector<1x16xf32> to vector<8x16xf32>
    %56 = arith.addf %53, %55 : vector<8x16xf32>
    %cst_22 = arith.constant 0.000000e+00 : f32
    %57 = vector.broadcast %cst_22 : f32 to vector<8x16xf32>
    %58 = arith.maximumf %56, %57 : vector<8x16xf32>
    %c112 = arith.constant 112 : index
    %c0_23 = arith.constant 0 : index
    %59 = vector.load %arg2[%c112, %c0_23] : memref<224x64xf32, #tpu.memory_space<vmem>>, vector<16x16xf32>
    %cst_24 = arith.constant dense<0.000000e+00> : vector<8x16xf32>
    %60 = tpu.matmul %58, %59, %cst_24 {dimension_numbers = #tpu.dot_dimension_numbers<[1], [0], [0], [1], [0, 0, 1, 1], [], []>} : vector<8x16xf32>, vector<16x16xf32>, vector<8x16xf32> -> vector<8x16xf32>
    %c128 = arith.constant 128 : index
    %c0_25 = arith.constant 0 : index
    %61 = vector.load %arg2[%c128, %c0_25] : memref<224x64xf32, #tpu.memory_space<vmem>>, vector<1x16xf32>
    %62 = vector.broadcast %61 : vector<1x16xf32> to vector<8x16xf32>
    %63 = arith.addf %60, %62 : vector<8x16xf32>
    %64 = tpu.iota {dimensions = array<i32: 1>} : vector<8x16xi32>
    %c8_i32 = arith.constant 8 : i32
    %65 = vector.broadcast %c8_i32 : i32 to vector<8x16xi32>
    %66 = arith.cmpi slt, %64, %65 : vector<8x16xi32>
    %cst_26 = arith.constant 2.000000e+01 : f32
    %67 = vector.broadcast %cst_26 : f32 to vector<8x16xf32>
    %68 = arith.minimumf %63, %67 : vector<8x16xf32>
    %69 = math.exp %68 : vector<8x16xf32>
    %70 = math.log1p %69 : vector<8x16xf32>
    %cst_27 = arith.constant 2.000000e+01 : f32
    %71 = vector.broadcast %cst_27 : f32 to vector<8x16xf32>
    %72 = arith.cmpf ogt, %63, %71 : vector<8x16xf32>
    %73 = arith.select %72, %63, %70 : vector<8x16xi1>, vector<8x16xf32>
    %74 = arith.select %66, %63, %73 : vector<8x16xi1>, vector<8x16xf32>
    %cst_28 = arith.constant 1.000000e-10 : f32
    %75 = vector.broadcast %cst_28 : f32 to vector<8x16xf32>
    %76 = arith.addf %73, %75 : vector<8x16xf32>
    %77 = math.sqrt %76 : vector<8x16xf32>
    %cst_29 = arith.constant 0.000000e+00 : f32
    %78 = vector.broadcast %cst_29 : f32 to vector<8x16xf32>
    %79 = arith.select %66, %63, %78 : vector<8x16xi1>, vector<8x16xf32>
    %c0_30 = arith.constant 0 : index
    %c0_31 = arith.constant 0 : index
    %80 = vector.load %arg1[%c0_30, %c0_31] : memref<8x16xf32, #tpu.memory_space<vmem>>, vector<8x16xf32>
    %81 = arith.mulf %77, %80 : vector<8x16xf32>
    %82 = arith.addf %79, %81 : vector<8x16xf32>
    %c136 = arith.constant 136 : index
    %c0_32 = arith.constant 0 : index
    %83 = vector.load %arg2[%c136, %c0_32] : memref<224x64xf32, #tpu.memory_space<vmem>>, vector<16x16xf32>
    %cst_33 = arith.constant dense<0.000000e+00> : vector<8x16xf32>
    %84 = tpu.matmul %82, %83, %cst_33 {dimension_numbers = #tpu.dot_dimension_numbers<[1], [0], [0], [1], [0, 0, 1, 1], [], []>} : vector<8x16xf32>, vector<16x16xf32>, vector<8x16xf32> -> vector<8x16xf32>
    %cst_34 = arith.constant dense<0.000000e+00> : vector<16xf32>
    %85 = vector.multi_reduction <add>, %84, %cst_34 [0] : vector<8x16xf32> to vector<16xf32>
    %86 = vector.shape_cast %85 : vector<16xf32> to vector<1x16xf32>
    %cst_35 = arith.constant 8.000000e+00 : f32
    %87 = vector.broadcast %cst_35 : f32 to vector<1x16xf32>
    %88 = arith.divf %86, %87 : vector<1x16xf32>
    %89 = arith.mulf %84, %84 : vector<8x16xf32>
    %cst_36 = arith.constant dense<0.000000e+00> : vector<16xf32>
    %90 = vector.multi_reduction <add>, %89, %cst_36 [0] : vector<8x16xf32> to vector<16xf32>
    %91 = vector.shape_cast %90 : vector<16xf32> to vector<1x16xf32>
    %cst_37 = arith.constant 8.000000e+00 : f32
    %92 = vector.broadcast %cst_37 : f32 to vector<1x16xf32>
    %93 = arith.divf %91, %92 : vector<1x16xf32>
    %94 = arith.mulf %88, %88 : vector<1x16xf32>
    %95 = arith.subf %93, %94 : vector<1x16xf32>
    %cst_38 = arith.constant 0.000000e+00 : f32
    %96 = vector.broadcast %cst_38 : f32 to vector<1x16xf32>
    %97 = arith.maximumf %95, %96 : vector<1x16xf32>
    %c152 = arith.constant 152 : index
    %c0_39 = arith.constant 0 : index
    %98 = vector.load %arg2[%c152, %c0_39] : memref<224x64xf32, #tpu.memory_space<vmem>>, vector<1x16xf32>
    %cst_40 = arith.constant 9.99999974E-6 : f32
    %99 = vector.broadcast %cst_40 : f32 to vector<1x16xf32>
    %100 = arith.addf %97, %99 : vector<1x16xf32>
    %101 = math.rsqrt %100 : vector<1x16xf32>
    %102 = arith.mulf %98, %101 : vector<1x16xf32>
    %103 = vector.broadcast %88 : vector<1x16xf32> to vector<8x16xf32>
    %104 = arith.subf %84, %103 : vector<8x16xf32>
    %105 = vector.broadcast %102 : vector<1x16xf32> to vector<8x16xf32>
    %106 = arith.mulf %104, %105 : vector<8x16xf32>
    %c153 = arith.constant 153 : index
    %c0_41 = arith.constant 0 : index
    %107 = vector.load %arg2[%c153, %c0_41] : memref<224x64xf32, #tpu.memory_space<vmem>>, vector<1x16xf32>
    %108 = vector.broadcast %107 : vector<1x16xf32> to vector<8x16xf32>
    %109 = arith.addf %106, %108 : vector<8x16xf32>
    %cst_42 = arith.constant 0.000000e+00 : f32
    %110 = vector.broadcast %cst_42 : f32 to vector<8x16xf32>
    %111 = arith.maximumf %109, %110 : vector<8x16xf32>
    %c160 = arith.constant 160 : index
    %c0_43 = arith.constant 0 : index
    %112 = vector.load %arg2[%c160, %c0_43] : memref<224x64xf32, #tpu.memory_space<vmem>>, vector<16x32xf32>
    %cst_44 = arith.constant dense<0.000000e+00> : vector<8x32xf32>
    %113 = tpu.matmul %111, %112, %cst_44 {dimension_numbers = #tpu.dot_dimension_numbers<[1], [0], [0], [1], [0, 0, 1, 1], [], []>} : vector<8x16xf32>, vector<16x32xf32>, vector<8x32xf32> -> vector<8x32xf32>
    %cst_45 = arith.constant dense<0.000000e+00> : vector<32xf32>
    %114 = vector.multi_reduction <add>, %113, %cst_45 [0] : vector<8x32xf32> to vector<32xf32>
    %115 = vector.shape_cast %114 : vector<32xf32> to vector<1x32xf32>
    %cst_46 = arith.constant 8.000000e+00 : f32
    %116 = vector.broadcast %cst_46 : f32 to vector<1x32xf32>
    %117 = arith.divf %115, %116 : vector<1x32xf32>
    %118 = arith.mulf %113, %113 : vector<8x32xf32>
    %cst_47 = arith.constant dense<0.000000e+00> : vector<32xf32>
    %119 = vector.multi_reduction <add>, %118, %cst_47 [0] : vector<8x32xf32> to vector<32xf32>
    %120 = vector.shape_cast %119 : vector<32xf32> to vector<1x32xf32>
    %cst_48 = arith.constant 8.000000e+00 : f32
    %121 = vector.broadcast %cst_48 : f32 to vector<1x32xf32>
    %122 = arith.divf %120, %121 : vector<1x32xf32>
    %123 = arith.mulf %117, %117 : vector<1x32xf32>
    %124 = arith.subf %122, %123 : vector<1x32xf32>
    %cst_49 = arith.constant 0.000000e+00 : f32
    %125 = vector.broadcast %cst_49 : f32 to vector<1x32xf32>
    %126 = arith.maximumf %124, %125 : vector<1x32xf32>
    %c176 = arith.constant 176 : index
    %c0_50 = arith.constant 0 : index
    %127 = vector.load %arg2[%c176, %c0_50] : memref<224x64xf32, #tpu.memory_space<vmem>>, vector<1x32xf32>
    %cst_51 = arith.constant 9.99999974E-6 : f32
    %128 = vector.broadcast %cst_51 : f32 to vector<1x32xf32>
    %129 = arith.addf %126, %128 : vector<1x32xf32>
    %130 = math.rsqrt %129 : vector<1x32xf32>
    %131 = arith.mulf %127, %130 : vector<1x32xf32>
    %132 = vector.broadcast %117 : vector<1x32xf32> to vector<8x32xf32>
    %133 = arith.subf %113, %132 : vector<8x32xf32>
    %134 = vector.broadcast %131 : vector<1x32xf32> to vector<8x32xf32>
    %135 = arith.mulf %133, %134 : vector<8x32xf32>
    %c177 = arith.constant 177 : index
    %c0_52 = arith.constant 0 : index
    %136 = vector.load %arg2[%c177, %c0_52] : memref<224x64xf32, #tpu.memory_space<vmem>>, vector<1x32xf32>
    %137 = vector.broadcast %136 : vector<1x32xf32> to vector<8x32xf32>
    %138 = arith.addf %135, %137 : vector<8x32xf32>
    %cst_53 = arith.constant 0.000000e+00 : f32
    %139 = vector.broadcast %cst_53 : f32 to vector<8x32xf32>
    %140 = arith.maximumf %138, %139 : vector<8x32xf32>
    %c184 = arith.constant 184 : index
    %c0_54 = arith.constant 0 : index
    %141 = vector.load %arg2[%c184, %c0_54] : memref<224x64xf32, #tpu.memory_space<vmem>>, vector<32x64xf32>
    %cst_55 = arith.constant dense<0.000000e+00> : vector<8x64xf32>
    %142 = tpu.matmul %140, %141, %cst_55 {dimension_numbers = #tpu.dot_dimension_numbers<[1], [0], [0], [1], [0, 0, 1, 1], [], []>} : vector<8x32xf32>, vector<32x64xf32>, vector<8x64xf32> -> vector<8x64xf32>
    %cst_56 = arith.constant dense<0.000000e+00> : vector<64xf32>
    %143 = vector.multi_reduction <add>, %142, %cst_56 [0] : vector<8x64xf32> to vector<64xf32>
    %144 = vector.shape_cast %143 : vector<64xf32> to vector<1x64xf32>
    %cst_57 = arith.constant 8.000000e+00 : f32
    %145 = vector.broadcast %cst_57 : f32 to vector<1x64xf32>
    %146 = arith.divf %144, %145 : vector<1x64xf32>
    %147 = arith.mulf %142, %142 : vector<8x64xf32>
    %cst_58 = arith.constant dense<0.000000e+00> : vector<64xf32>
    %148 = vector.multi_reduction <add>, %147, %cst_58 [0] : vector<8x64xf32> to vector<64xf32>
    %149 = vector.shape_cast %148 : vector<64xf32> to vector<1x64xf32>
    %cst_59 = arith.constant 8.000000e+00 : f32
    %150 = vector.broadcast %cst_59 : f32 to vector<1x64xf32>
    %151 = arith.divf %149, %150 : vector<1x64xf32>
    %152 = arith.mulf %146, %146 : vector<1x64xf32>
    %153 = arith.subf %151, %152 : vector<1x64xf32>
    %cst_60 = arith.constant 0.000000e+00 : f32
    %154 = vector.broadcast %cst_60 : f32 to vector<1x64xf32>
    %155 = arith.maximumf %153, %154 : vector<1x64xf32>
    %c216 = arith.constant 216 : index
    %c0_61 = arith.constant 0 : index
    %156 = vector.load %arg2[%c216, %c0_61] : memref<224x64xf32, #tpu.memory_space<vmem>>, vector<1x64xf32>
    %cst_62 = arith.constant 9.99999974E-6 : f32
    %157 = vector.broadcast %cst_62 : f32 to vector<1x64xf32>
    %158 = arith.addf %155, %157 : vector<1x64xf32>
    %159 = math.rsqrt %158 : vector<1x64xf32>
    %160 = arith.mulf %156, %159 : vector<1x64xf32>
    %161 = vector.broadcast %146 : vector<1x64xf32> to vector<8x64xf32>
    %162 = arith.subf %142, %161 : vector<8x64xf32>
    %163 = vector.broadcast %160 : vector<1x64xf32> to vector<8x64xf32>
    %164 = arith.mulf %162, %163 : vector<8x64xf32>
    %c217 = arith.constant 217 : index
    %c0_63 = arith.constant 0 : index
    %165 = vector.load %arg2[%c217, %c0_63] : memref<224x64xf32, #tpu.memory_space<vmem>>, vector<1x64xf32>
    %166 = vector.broadcast %165 : vector<1x64xf32> to vector<8x64xf32>
    %167 = arith.addf %164, %166 : vector<8x64xf32>
    %c0_64 = arith.constant 0 : index
    %c0_65 = arith.constant 0 : index
    %168 = vector.load %arg3[%c0_64, %c0_65] : memref<8x80xf32, #tpu.memory_space<vmem>>, vector<8x16xf32>
    tpu.vector_store %arg3[%c0_64, %c0_65], %74 {strides = array<i32>} : memref<8x80xf32, #tpu.memory_space<vmem>>, vector<8x16xf32>,
    %c0_66 = arith.constant 0 : index
    %c16 = arith.constant 16 : index
    %169 = vector.load %arg3[%c0_66, %c16] : memref<8x80xf32, #tpu.memory_space<vmem>>, vector<8x64xf32>
    tpu.vector_store %arg3[%c0_66, %c16], %167 {strides = array<i32>} : memref<8x80xf32, #tpu.memory_space<vmem>>, vector<8x64xf32>,
    return
  }
}

</mosaic_0001>

<bundles_post_ra>
// kernel: tpu_custom_call.1
= control target key start
LH: loop header
LB: loop body
LE: loop exit
PB: predicated region body
PF: predicated region fallthrough
CT: control target
= control target key end

     0   :  { %v900_v3 = vmov 0.0|0.0   ;;  %vm901_vm0 = vmmov 0   ;;  %v902_v6 = vmov 0.0   ;;  %s1091_s0 = inlined_call_operand.vmem [shape: f32[8,64], index: 0, kind: input, shape index: {}]   ;;  %s1092_s1 = inlined_call_operand.vmem [shape: f32[8,16], index: 1, kind: input, shape index: {}]   ;;  %s1093_s2 = inlined_call_operand.vmem [shape: f32[224,64], index: 2, kind: input, shape index: {}]   ;;  %s1094_s3 = inlined_call_operand.hbm [shape: f32[8,80], index: 3, kind: output, shape index: {}]  }
   0x1   :  { %v16_v0 = vld [vmem:[%s1093_s2] sm:$0xff]  ;;  %v17_v1 = vld [vmem:[%s1093_s2 + $0x8] sm:$0xff]  ;;  %v18_v2 = vld [vmem:[%s1093_s2 + $0x10] sm:$0xff]  ;;  %822 = vmatprep.subr.bf16.mxu0 %v900_v3  ;;  %776 = vmatprep.mubr.msk.f32.mxu0 %vm901_vm0, %v902_v6 }
   0x2   :  { %v823_v4 = vpack.c.bf16 %v17_v1, %v16_v0  ;;  %v19_v5 = vld [vmem:[%s1093_s2 + $0x18] sm:$0xff]  ;;  %834 = vmatprep.subr.bf16.mxu1 %v900_v3  ;;  %787 = vmatprep.mubr.msk.f32.mxu1 %vm901_vm0, %v902_v6 }
   0x3   :  { %v826_v7 = vpack.c.bf16 %v19_v5, %v18_v2 }
   0x4   :  { %824 = vmatpush3.bf16.msra.mxu0 %v823_v4 }
   0x5   :  { %8 = vsyncpa [#allocation3], 0  ;;  %825 = vmatprep.subr.bf16.mxu0 %v900_v3  ;;  %v20_v8 = vld [vmem:[%s1093_s2 + $0x20] sm:$0xff]  ;;  %v21_v9 = vld [vmem:[%s1093_s2 + $0x28] sm:$0xff]  ;;  %vm24_vm1 = vcmask 523264   ;;  %vm98_vm2 = vcmask 261120   ;;  %v125_v44 = vlaneseq }
   0x6   :  { %v829_v10 = vpack.c.bf16 %v21_v9, %v20_v8  ;;  %v22_v11 = vld [vmem:[%s1093_s2 + $0x30] sm:$0xff]  ;;  %v23_v12 = vld [vmem:[%s1093_s2 + $0x38] sm:$0xff]  ;;  %v15_v14 = vld [vmem:[%s1091_s0] sm:$0xff]  ;;  %vm214_vm3 = vcmask 130048   ;;  %s903_s25 = smov 16   ;;  %s904_s26 = smov [#allocation2]  }
   0x7   :  { %v832_v13 = vpack.c.bf16 %v23_v12, %v22_v11  ;;  %v137_v15 = vld [vmem:[%s1093_s2 + $0x48] sm:$0xff]  ;;  %v138_v16 = vld [vmem:[%s1093_s2 + $0x50] sm:$0xff]  ;;  %v139_v18 = vld [vmem:[%s1093_s2 + $0x58] sm:$0xff]  ;;  %v126_v45 = vshrl.u32 %v125_v44, 7  ;;  %s712_s27 = sshll.u32 %s904_s26, 4  ;;  %vm704_vm9 = vcmask 654464   ;;  %s713_s27 = int_to_ptr.vmem [resolvable:$true] %s712_s27 }
   0x8   :  { %827 = vmatpush3.bf16.msra.mxu0 %v826_v7  ;;  %v835_v17 = vpack.c.bf16 %v138_v16, %v137_v15  ;;  %v140_v19 = vld [vmem:[%s1093_s2 + $0x60] sm:$0xff]  ;;  %v252_v56 = vld [vmem:[%s1093_s2 + $0x70] sm:$0xff]  ;;  %v253_v57 = vld [vmem:[%s1093_s2 + $0x78] sm:$0xff]  ;;  %s876_s28 = scalar_lea.vmem %s713_s27, 128  ;;  %p881_p1 = scmp.lt.s32.totalorder %s713_s27, %s713_s27 }
   0x9   :  { %828 = vmatprep.subr.bf16.mxu0 %v900_v3  ;;  %v838_v20 = vpack.c.bf16 %v140_v19, %v139_v18  ;;  %v120_v46 = vld [vmem:[%s1093_s2 + $0x40] sm:$0x1]  ;;  %v985_v47 = vsub.s32 0, %v126_v45  ;;  %v721_v52 = vld [vmem:[%s1093_s2 + $0x41] ss:$0 sm:$0xff]  ;;  %v841_v58 = vpack.c.bf16 %v253_v57, %v252_v56  ;;  %v333_v45 = vand.u32 127, %v125_v44  ;;  %p877_p0 = scmp.ne.s32.totalorder %s713_s27, %s876_s28  ;;  %p882_p2 = scmp.lt.s32.totalorder %s876_s28, %s876_s28 }
   0xa   :  { %836 = vmatpush3.bf16.msra.mxu1 %v835_v17  ;;  %v359_v44 = vld [vmem:[%s1092_s1] sm:$0xff] }
   0xb   :  { %837 = vmatprep.subr.bf16.mxu1 %v900_v3  ;;  %vm334_vm6 = vcmp.lt.s32.totalorder %v333_v45, 8  ;;  %p883_p3 = por %p882_p2, %p881_p1 }
   0xc   :  { %830 = vmatpush3.bf16.msra.mxu0 %v829_v10 }
   0xd   :  { %831 = vmatprep.subr.bf16.mxu0 %v900_v3  ;;  %p884_p4 = pnand %p883_p3, %p877_p0 }
   0xe   :  { %839 = vmatpush3.bf16.msra.mxu1 %v838_v20  ;;  %v235_v20 = vld [vmem:[%s1093_s2 + $0x68] sm:$0x1] }
   0xf   :  { %840 = vmatprep.subr.bf16.mxu1 %v900_v3 }
  0x10   :  { %833 = vmatpush3.bf16.msra.mxu0 %v832_v13 }
  0x11   :  { %846 = vmatprep.subr.bf16.mxu0 %v900_v3 }
  0x13   :  { %777 = vmatmul.mubr.msk.f32.vlgmr.msra.gmra.mrb[0].mxu0 %vm24_vm1, %v15_v14 }
  0x14   :  { %808 = vmatprep.mubr.msk.f32.mxu0 %vm901_vm0, %v902_v6 }
  0xe6   :  { %v94_v21 = vpop.f32.mrb[0].mxu0 }
  0xe7   :  { %v99_v22 = vsel %vm98_vm2, %v94_v21, 0.0  ;;  %v108_v23 = vmul.f32 %v94_v21, %v94_v21  ;;  %v778_v24 = vpop.f32.mrb[1].mxu0 }
  0xe8   :  { %v100_v25 = vrot.slane %v99_v22, 4 }
  0xe9   :  { %v109_v26 = vsel %vm98_vm2, %v108_v23, 0.0 }
  0xea   :  { %v101_v27 = vadd.f32 %v100_v25, %v99_v22  ;;  %v110_v28 = vrot.slane %v109_v26, 4  ;;  %v723_v25 = vld [vmem:[%s1093_s2 + $0x69] ss:$0 sm:$0xff] }
  0xec   :  { %v102_v29 = vrot.slane %v101_v27, 2  ;;  %v111_v30 = vadd.f32 %v110_v28, %v109_v26 }
  0xee   :  { %v103_v31 = vadd.f32 %v102_v29, %v101_v27  ;;  %v112_v32 = vrot.slane %v111_v30, 2  ;;  %v362_v29 = vld [vmem:[%s1093_s2 + $0x88] sm:$0xff] }
  0xf0   :  { %v104_v33 = vrot.slane %v103_v31, 1  ;;  %v113_v34 = vadd.f32 %v112_v32, %v111_v30  ;;  %v363_v30 = vld [vmem:[%s1093_s2 + $0x90] sm:$0xff]  ;;  %v724_v32 = vld [vmem:[%s1093_s2 + $0x80] ss:$0 sm:$0xff] }
  0xf2   :  { %v105_v35 = vadd.f32 %v104_v33, %v103_v31  ;;  %v114_v36 = vrot.slane %v113_v34, 1  ;;  %v844_v31 = vpack.c.bf16 %v363_v30, %v362_v29  ;;  %v727_v29 = vld [vmem:[%s1093_s2 + $0x99] ss:$0 sm:$0xff] }
  0xf4   :  { %v107_v37 = vmul.f32 0.125, %v105_v35  ;;  %v115_v38 = vadd.f32 %v114_v36, %v113_v34 }
  0xf6   :  { %v116_v39 = vmul.f32 0.125, %v115_v38  ;;  %v117_v40 = vmul.f32 %v107_v37, %v107_v37  ;;  %v124_v50 = vsub.f32 %v94_v21, %v107_v37 }
  0xf8   :  { %v118_v41 = vsub.f32 %v116_v39, %v117_v40 }
  0xfa   :  { %v119_v42 = vmax.f32 %v118_v41, 0.0 }
  0xfc   :  { %v121_v43 = vadd.f32 1e-05, %v119_v42 }
  0xfe   :  { %860 = vrsqrt.f32 %v121_v43 }
 0x108   :  { %v861_v48 = vpop.eup %860 }
 0x109   :  { %v123_v49 = vmul.f32 %v861_v48, %v120_v46 }
 0x10b   :  { %v128_v51 = vrot.slane %v123_v49, %v985_v47 }
 0x10d   :  { %v129_v53 = vmul.f32 %v128_v51, %v124_v50 }
 0x10f   :  { %v135_v54 = vadd.f32 %v721_v52, %v129_v53 }
 0x111   :  { %v136_v55 = vmax.f32 %v135_v54, 0.0 }
 0x113   :  { %788 = vmatmul.mubr.msk.f32.vlgmr.msra.gmra.mrb[0].mxu1 %vm98_vm2, %v136_v55 }
 0x114   :  { %794 = vmatprep.mubr.msk.f32.mxu1 %vm901_vm0, %v902_v6  ;;  %842 = vmatpush3.bf16.msra.mxu1 %v841_v58 }
 0x115   :  { %843 = vmatprep.subr.bf16.mxu1 %v900_v3 }
 0x1e6   :  { %v210_v59 = vpop.f32.mrb[0].mxu1 }
 0x1e7   :  { %v215_v60 = vsel %vm214_vm3, %v210_v59, 0.0  ;;  %v223_v61 = vmul.f32 %v210_v59, %v210_v59  ;;  %v789_v62 = vpop.f32.mrb[1].mxu1 }
 0x1e8   :  { %v216_v63 = vrot.slane %v215_v60, 4  ;;  %v475_v62 = vld [vmem:[%s1093_s2 + $0xa8] sm:$0xff] }
 0x1e9   :  { %v224_v0 = vsel %vm214_vm3, %v223_v61, 0.0  ;;  %v474_v61 = vld [vmem:[%s1093_s2 + $0xa0] sm:$0xff] }
 0x1ea   :  { %v217_v1 = vadd.f32 %v216_v63, %v215_v60  ;;  %v225_v2 = vrot.slane %v224_v0, 4  ;;  %v847_v63 = vpack.c.bf16 %v475_v62, %v474_v61  ;;  %v569_v62 = vld [vmem:[%s1093_s2 + $0xb0] sm:$0x1] }
 0x1ec   :  { %v218_v4 = vrot.slane %v217_v1, 2  ;;  %v226_v5 = vadd.f32 %v225_v2, %v224_v0  ;;  %848 = vmatpush3.bf16.msra.mxu0 %v847_v63 }
 0x1ee   :  { %v219_v7 = vadd.f32 %v218_v4, %v217_v1  ;;  %v227_v8 = vrot.slane %v226_v5, 2 }
 0x1f0   :  { %v220_v9 = vrot.slane %v219_v7, 1  ;;  %v228_v10 = vadd.f32 %v227_v8, %v226_v5 }
 0x1f2   :  { %v221_v11 = vadd.f32 %v220_v9, %v219_v7  ;;  %v229_v12 = vrot.slane %v228_v10, 1 }
 0x1f4   :  { %v222_v13 = vmul.f32 0.125, %v221_v11  ;;  %v230_v14 = vadd.f32 %v229_v12, %v228_v10 }
 0x1f6   :  { %v231_v15 = vmul.f32 0.125, %v230_v14  ;;  %v232_v16 = vmul.f32 %v222_v13, %v222_v13  ;;  %v239_v23 = vsub.f32 %v210_v59, %v222_v13 }
 0x1f8   :  { %v233_v17 = vsub.f32 %v231_v15, %v232_v16 }
 0x1fa   :  { %v234_v18 = vmax.f32 %v233_v17, 0.0 }
 0x1fc   :  { %v236_v19 = vadd.f32 1e-05, %v234_v18 }
 0x1fe   :  { %862 = vrsqrt.f32 %v236_v19 }
 0x208   :  { %v863_v21 = vpop.eup %862 }
 0x209   :  { %v238_v22 = vmul.f32 %v863_v21, %v235_v20 }
 0x20b   :  { %v243_v24 = vrot.slane %v238_v22, %v985_v47 }
 0x20d   :  { %v244_v26 = vmul.f32 %v243_v24, %v239_v23  ;;  %v457_v24 = vld [vmem:[%s1093_s2 + $0x98] sm:$0x1] }
 0x20f   :  { %v250_v27 = vadd.f32 %v723_v25, %v244_v26 }
 0x211   :  { %v251_v28 = vmax.f32 %v250_v27, 0.0 }
 0x213   :  { %795 = vmatmul.mubr.msk.f32.vlgmr.msra.gmra.mrb[2].mxu1 %vm214_vm3, %v251_v28 }
 0x214   :  { %801 = vmatprep.mubr.msk.f32.mxu1 %vm901_vm0, %v902_v6  ;;  %845 = vmatpush3.bf16.msra.mxu1 %v844_v31 }
 0x215   :  { %849 = vmatprep.subr.bf16.mxu1 %v900_v3 }
 0x2e6   :  { %v328_v33 = vpop.f32.mrb[2].mxu1 }
 0x2e7   :  { %v329_v34 = vadd.f32 %v724_v32, %v328_v33  ;;  %v796_v35 = vpop.f32.mrb[3].mxu1  ;;  %v586_v33 = vld [vmem:[%s1093_s2 + $0xb8] sm:$0xff] }
 0x2e9   :  { %v335_v36 = vmin.f32 %v329_v34, 20.0  ;;  %vm347_vm5 = vcmp.gt.f32.partialorder %v329_v34, 20.0  ;;  %v358_v59 = vsel %vm334_vm6, %v329_v34, 0.0 }
 0x2eb   :  { %v336_v37 = vmul.f32 1.442695, %v335_v36  ;;  %v588_v36 = vld [vmem:[%s1093_s2 + $0xc8] sm:$0xff] }
 0x2ed   :  { %864 = vpow2.f32 %v336_v37  ;;  %v589_v37 = vld [vmem:[%s1093_s2 + $0xd0] sm:$0xff] }
 0x2f7   :  { %v865_v38 = vpop.eup %864 }
 0x2f8   :  { %v338_v39 = vadd.f32 1.0, %v865_v38  ;;  %v341_v40 = vmul.f32 -0.5, %v865_v38  ;;  %v344_v42 = vand.u32 2147483647, %v865_v38 }
 0x2fa   :  { %866 = vlog2.f32 %v338_v39  ;;  %v342_v41 = vadd.f32 1.0, %v341_v40  ;;  %vm345_vm4 = vcmp.lt.f32.partialorder %v344_v42, 0.0004427343 }
 0x2fc   :  { %v343_v48 = vmul.f32 %v865_v38, %v342_v41  ;;  %v853_v38 = vpack.c.bf16 %v589_v37, %v588_v36  ;;  %v731_v36 = vld [vmem:[%s1093_s2 + $0xd9] ss:$0 sm:$0xff] }
 0x304   :  { %v867_v43 = vpop.eup %866 }
 0x305   :  { %v340_v46 = vmul.f32 0.6931472, %v867_v43 }
 0x307   :  { %v346_v49 = vsel %vm345_vm4, %v343_v48, %v340_v46 }
 0x308   :  { %v348_v50 = vsel %vm347_vm5, %v329_v34, %v346_v49 }
 0x309   :  { %v350_v51 = vadd.f32 1e-10, %v348_v50  ;;  %v349_v52 = vsel %vm334_vm6, %v329_v34, %v348_v50  ;;  %v587_v34 = vld [vmem:[%s1093_s2 + $0xc0] sm:$0xff] }
 0x30a   :  { %699 = vst.msk [vmem:[#allocation2] sm:$0xff] %vm214_vm3, %v349_v52  ;;  %v850_v35 = vpack.c.bf16 %v587_v34, %v586_v33 }
 0x30b   :  { %868 = vrsqrt.f32 %v350_v51  ;;  %vm353_vm7 = vcmp.eq.f32.partialorder %v350_v51, inf  ;;  %v356_v55 = vand.u32 2147483648, %v350_v51  ;;  %vm355_vm8 = vcmp.eq.f32.partialorder %v350_v51, 0.0 }
 0x315   :  { %v869_v53 = vpop.eup %868 }
 0x316   :  { %v352_v54 = vmul.f32 %v869_v53, %v350_v51 }
 0x318   :  { %v354_v56 = vsel %vm353_vm7, %v350_v51, %v352_v54 }
 0x319   :  { %v357_v57 = vsel %vm355_vm8, %v356_v55, %v354_v56 }
 0x31a   :  { %v360_v58 = vmul.f32 %v359_v44, %v357_v57 }
 0x31c   :  { %v361_v60 = vadd.f32 %v360_v58, %v358_v59 }
 0x31e   :  { %802 = vmatmul.mubr.msk.f32.vlgmr.msra.gmra.mrb[4].mxu1 %vm214_vm3, %v361_v60 }
 0x31f   :  { %819 = vmatprep.mubr.msk.f32.mxu1 %vm901_vm0, %v902_v6  ;;  %851 = vmatpush3.bf16.msra.mxu1 %v850_v35 }
 0x320   :  { %852 = vmatprep.subr.bf16.mxu1 %v900_v3 }
 0x323   :  { %854 = vmatpush3.bf16.msra.mxu1 %v853_v38 }
 0x3f1   :  { %v433_v0 = vpop.f32.mrb[4].mxu1 }
 0x3f2   :  { %v437_v1 = vsel %vm214_vm3, %v433_v0, 0.0  ;;  %v445_v2 = vmul.f32 %v433_v0, %v433_v0  ;;  %v803_v4 = vpop.f32.mrb[5].mxu1 }
 0x3f3   :  { %v438_v5 = vrot.slane %v437_v1, 4  ;;  %v729_v4 = vld [vmem:[%s1093_s2 + $0xb1] ss:$0 sm:$0xff] }
 0x3f4   :  { %v446_v7 = vsel %vm214_vm3, %v445_v2, 0.0 }
 0x3f5   :  { %v439_v8 = vadd.f32 %v438_v5, %v437_v1  ;;  %v447_v6 = vrot.slane %v446_v7, 4 }
 0x3f7   :  { %v440_v9 = vrot.slane %v439_v8, 2  ;;  %v448_v10 = vadd.f32 %v447_v6, %v446_v7 }
 0x3f9   :  { %v441_v11 = vadd.f32 %v440_v9, %v439_v8  ;;  %v449_v12 = vrot.slane %v448_v10, 2 }
 0x3fb   :  { %v442_v13 = vrot.slane %v441_v11, 1  ;;  %v450_v14 = vadd.f32 %v449_v12, %v448_v10 }
 0x3fd   :  { %v443_v15 = vadd.f32 %v442_v13, %v441_v11  ;;  %v451_v16 = vrot.slane %v450_v14, 1 }
 0x3ff   :  { %v444_v17 = vmul.f32 0.125, %v443_v15  ;;  %v452_v18 = vadd.f32 %v451_v16, %v450_v14 }
 0x401   :  { %v453_v19 = vmul.f32 0.125, %v452_v18  ;;  %v454_v20 = vmul.f32 %v444_v17, %v444_v17  ;;  %v461_v27 = vsub.f32 %v433_v0, %v444_v17 }
 0x403   :  { %v455_v21 = vsub.f32 %v453_v19, %v454_v20 }
 0x405   :  { %v456_v22 = vmax.f32 %v455_v21, 0.0 }
 0x407   :  { %v458_v23 = vadd.f32 1e-05, %v456_v22 }
 0x409   :  { %870 = vrsqrt.f32 %v458_v23 }
 0x413   :  { %v871_v25 = vpop.eup %870 }
 0x414   :  { %v460_v26 = vmul.f32 %v871_v25, %v457_v24 }
 0x416   :  { %v465_v28 = vrot.slane %v460_v26, %v985_v47 }
 0x418   :  { %v466_v30 = vmul.f32 %v465_v28, %v461_v27 }
 0x41a   :  { %v472_v31 = vadd.f32 %v727_v29, %v466_v30 }
 0x41c   :  { %v473_v32 = vmax.f32 %v472_v31, 0.0  ;;  %v683_v31 = vld [vmem:[%s1093_s2 + $0xd8] sm:$0x1] }
 0x41e   :  { %809 = vmatmul.mubr.msk.f32.vlgmr.msra.gmra.mrb[2].mxu0 %vm214_vm3, %v473_v32 }
 0x4f1   :  { %v545_v39 = vpop.f32.mrb[2].mxu0 }
 0x4f2   :  { %v549_v40 = vsel %vm98_vm2, %v545_v39, 0.0  ;;  %v557_v41 = vmul.f32 %v545_v39, %v545_v39  ;;  %v810_v42 = vpop.f32.mrb[3].mxu0 }
 0x4f3   :  { %v550_v43 = vrot.slane %v549_v40, 4 }
 0x4f4   :  { %v558_v45 = vsel %vm98_vm2, %v557_v41, 0.0 }
 0x4f5   :  { %v551_v46 = vadd.f32 %v550_v43, %v549_v40  ;;  %v559_v3 = vrot.slane %v558_v45, 4 }
 0x4f7   :  { %v552_v48 = vrot.slane %v551_v46, 2  ;;  %v560_v49 = vadd.f32 %v559_v3, %v558_v45 }
 0x4f9   :  { %v553_v50 = vadd.f32 %v552_v48, %v551_v46  ;;  %v561_v51 = vrot.slane %v560_v49, 2 }
 0x4fb   :  { %v554_v52 = vrot.slane %v553_v50, 1  ;;  %v562_v53 = vadd.f32 %v561_v51, %v560_v49 }
 0x4fd   :  { %v555_v54 = vadd.f32 %v554_v52, %v553_v50  ;;  %v563_v55 = vrot.slane %v562_v53, 1 }
 0x4ff   :  { %v556_v44 = vmul.f32 0.125, %v555_v54  ;;  %v564_v56 = vadd.f32 %v563_v55, %v562_v53 }
 0x501   :  { %v565_v57 = vmul.f32 0.125, %v564_v56  ;;  %v566_v58 = vmul.f32 %v556_v44, %v556_v44  ;;  %v573_v1 = vsub.f32 %v545_v39, %v556_v44 }
 0x503   :  { %v567_v59 = vsub.f32 %v565_v57, %v566_v58 }
 0x505   :  { %v568_v60 = vmax.f32 %v567_v59, 0.0 }
 0x507   :  { %v570_v61 = vadd.f32 1e-05, %v568_v60 }
 0x509   :  { %872 = vrsqrt.f32 %v570_v61 }
 0x513   :  { %v873_v63 = vpop.eup %872 }
 0x514   :  { %v572_v0 = vmul.f32 %v873_v63, %v569_v62 }
 0x516   :  { %v577_v2 = vrot.slane %v572_v0, %v985_v47 }
 0x518   :  { %v578_v5 = vmul.f32 %v577_v2, %v573_v1 }
 0x51a   :  { %v584_v7 = vadd.f32 %v729_v4, %v578_v5 }
 0x51c   :  { %v585_v8 = vmax.f32 %v584_v7, 0.0 }
 0x51e   :  { %820 = vmatmul.mubr.msk.f32.vlgmr.msra.gmra.mrb[6].mxu1 %vm98_vm2, %v585_v8 }
 0x5f1   :  { %v659_v6 = vpop.f32.mrb[6].mxu1 }
 0x5f2   :  { %v663_v9 = vsel %vm24_vm1, %v659_v6, 0.0  ;;  %v671_v10 = vmul.f32 %v659_v6, %v659_v6  ;;  %v821_v11 = vpop.f32.mrb[7].mxu1 }
 0x5f3   :  { %v664_v12 = vrot.slane %v663_v9, 4 }
 0x5f4   :  { %v672_v13 = vsel %vm24_vm1, %v671_v10, 0.0 }
 0x5f5   :  { %v665_v14 = vadd.f32 %v664_v12, %v663_v9  ;;  %v673_v15 = vrot.slane %v672_v13, 4 }
 0x5f7   :  { %v666_v16 = vrot.slane %v665_v14, 2  ;;  %v674_v17 = vadd.f32 %v673_v15, %v672_v13 }
 0x5f9   :  { %v667_v18 = vadd.f32 %v666_v16, %v665_v14  ;;  %v675_v19 = vrot.slane %v674_v17, 2 }
 0x5fb   :  { %v668_v20 = vrot.slane %v667_v18, 1  ;;  %v676_v21 = vadd.f32 %v675_v19, %v674_v17 }
 0x5fd   :  { %v669_v22 = vadd.f32 %v668_v20, %v667_v18  ;;  %v677_v23 = vrot.slane %v676_v21, 1 }
 0x5ff   :  { %v670_v24 = vmul.f32 0.125, %v669_v22  ;;  %v678_v25 = vadd.f32 %v677_v23, %v676_v21 }
 0x601   :  { %v679_v26 = vmul.f32 0.125, %v678_v25  ;;  %v680_v27 = vmul.f32 %v670_v24, %v670_v24  ;;  %v687_v34 = vsub.f32 %v659_v6, %v670_v24 }
 0x603   :  { %v681_v28 = vsub.f32 %v679_v26, %v680_v27 }
 0x605   :  { %v682_v29 = vmax.f32 %v681_v28, 0.0 }
 0x607   :  { %v684_v30 = vadd.f32 1e-05, %v682_v29 }
 0x609   :  { %874 = vrsqrt.f32 %v684_v30 }
 0x613   :  { %v875_v32 = vpop.eup %874 }
 0x614   :  { %v686_v33 = vmul.f32 %v875_v32, %v683_v31 }
 0x616   :  { %v691_v35 = vrot.slane %v686_v33, %v985_v47 }
 0x618   :  { %v692_v37 = vmul.f32 %v691_v35, %v687_v34 }
 0x61a   :  { %v698_v38 = vadd.f32 %v731_v36, %v692_v37 }
 0x61c   :  { %701 = vrot.lane.b32.xlu0 %v698_v38, %s903_s25 }
 0x68e   :  { %v702_v39 = vpop.permute.xlu0 %701 }
 0x68f   :  { %705 = vst.msk [vmem:[#allocation2] sm:$0xff] %vm704_vm9, %v702_v39 }
 0x690   :  { %887 = shalt.err (!%p884_p4)
}
 0x691   :  { %s888_s2 = scalar_lea.hbm %s1094_s3, 128 }
 0x692   :  { %p889_p5 = scmp.ne.s32.totalorder %s1094_s3, %s888_s2  ;;  %p892_p6 = scmp.lt.u32.totalorder %s888_s2, %s1094_s3 }
 0x694   :  { %p894_p7 = pnand %p892_p6, %p889_p5 }
 0x696   :  { %897 = shalt.err (!%p894_p7)
}
 0x697   :  { %715 = dma.vmem_to_hbm [thread:$0]  %s713_s27, 128, %s1094_s3, [#allocation3]  }
 0x698   :  { %898 = dma.done.wait [#allocation3], 128  }
 0x699   :  { %899 = vsyncadd [#allocation3], 4294967168 }
 0x69a   :  { %719 = vsyncpa [#allocation3], 1 }

</bundles_post_ra>
